<compile_context>
chip_gen: v7x
topology: tpu7x:2x2x1
jax: 0.10.0
libtpu: 0.0.40
codegen_flags: <defaults>
</compile_context>

<pallas_src>
import functools

import jax
import jax.numpy as jnp
from jax.experimental import pallas as pl
from jax.experimental.pallas import tpu as pltpu


# ----------------------------------------------------------------------------
# helpers
# ----------------------------------------------------------------------------

def _pick_tile(dim, target, align):
    """Largest tile <= target that divides `dim` and respects TPU alignment;
    falls back to the full dimension (always legal for BlockSpec)."""
    if dim <= target:
        return dim
    t = target
    while t >= align:
        if dim % t == 0:
            return t
        t //= 2
    return dim


def _cparams(*dimension_semantics):
    return pltpu.CompilerParams(
        dimension_semantics=dimension_semantics,
        vmem_limit_bytes=32 * 1024 * 1024,
    )


# ----------------------------------------------------------------------------
# Pallas kernels
# ----------------------------------------------------------------------------

def _matmul_bias_kernel(x_ref, w_ref, b_ref, o_ref, acc_ref, *, activation):
    @pl.when(pl.program_id(2) == 0)
    def _():
        acc_ref[...] = jnp.zeros_like(acc_ref)

    acc_ref[...] += jnp.dot(x_ref[...], w_ref[...],
                            preferred_element_type=jnp.float32)

    @pl.when(pl.program_id(2) == pl.num_programs(2) - 1)
    def _():
        acc = acc_ref[...] + b_ref[...]
        if activation == "gelu":
            # TODO(synk): HF BERT uses exact erf-gelu; tanh approximation kept
            # for guaranteed Mosaic lowering of the transcendental.
            acc = jax.nn.gelu(acc, approximate=True)
        elif activation == "tanh":
            acc = jnp.tanh(acc)
        o_ref[...] = acc.astype(o_ref.dtype)


def matmul_bias(x, w, b, activation=None, *, tm=256, tn=256, tk=512):
    """(M,K) @ (K,N) + b[N] with optional activation. bf16 MXU inputs, f32 acc."""
    M, K = x.shape
    N = w.shape[1]
    tm = _pick_tile(M, tm, 8)
    tn = _pick_tile(N, tn, 128)
    tk = _pick_tile(K, tk, 128)
    kern = functools.partial(_matmul_bias_kernel, activation=activation)
    return pl.pallas_call(
        kern,
        out_shape=jax.ShapeDtypeStruct((M, N), jnp.float32),
        grid=(M // tm, N // tn, K // tk),
        in_specs=[
            pl.BlockSpec((tm, tk), lambda i, j, k: (i, k)),
            pl.BlockSpec((tk, tn), lambda i, j, k: (k, j)),
            pl.BlockSpec((1, tn), lambda i, j, k: (0, j)),
        ],
        out_specs=pl.BlockSpec((tm, tn), lambda i, j, k: (i, j)),
        scratch_shapes=[pltpu.VMEM((tm, tn), jnp.float32)],
        compiler_params=_cparams("parallel", "parallel", "arbitrary"),
    )(x.astype(jnp.bfloat16), w.astype(jnp.bfloat16),
      b.reshape(1, N).astype(jnp.float32))


def _matmul_res_ln_kernel(x_ref, w_ref, b_ref, res_ref, g_ref, bln_ref,
                          o_ref, acc_ref, *, eps):
    @pl.when(pl.program_id(1) == 0)
    def _():
        acc_ref[...] = jnp.zeros_like(acc_ref)

    acc_ref[...] += jnp.dot(x_ref[...], w_ref[...],
                            preferred_element_type=jnp.float32)

    @pl.when(pl.program_id(1) == pl.num_programs(1) - 1)
    def _():
        h = acc_ref[...] + b_ref[...] + res_ref[...].astype(jnp.float32)
        mu = jnp.mean(h, axis=-1, keepdims=True)
        var = jnp.mean((h - mu) ** 2, axis=-1, keepdims=True)
        norm = (h - mu) * jax.lax.rsqrt(var + eps)
        o_ref[...] = (norm * g_ref[...] + bln_ref[...]).astype(o_ref.dtype)


def matmul_bias_residual_ln(x, w, b, residual, gamma, beta, *,
                            eps=1e-12, tm=256, tk=512):
    """LayerNorm((x @ w + b) + residual), fused.  The output (hidden) dim is
    kept whole per block so the LayerNorm reduction stays inside one tile."""
    M, K = x.shape
    N = w.shape[1]
    tm = _pick_tile(M, tm, 8)
    tk = _pick_tile(K, tk, 128)
    kern = functools.partial(_matmul_res_ln_kernel, eps=eps)
    return pl.pallas_call(
        kern,
        out_shape=jax.ShapeDtypeStruct((M, N), jnp.float32),
        grid=(M // tm, K // tk),
        in_specs=[
            pl.BlockSpec((tm, tk), lambda i, k: (i, k)),
            pl.BlockSpec((tk, N), lambda i, k: (k, 0)),
            pl.BlockSpec((1, N), lambda i, k: (0, 0)),
            pl.BlockSpec((tm, N), lambda i, k: (i, 0)),
            pl.BlockSpec((1, N), lambda i, k: (0, 0)),
            pl.BlockSpec((1, N), lambda i, k: (0, 0)),
        ],
        out_specs=pl.BlockSpec((tm, N), lambda i, k: (i, 0)),
        scratch_shapes=[pltpu.VMEM((tm, N), jnp.float32)],
        compiler_params=_cparams("parallel", "arbitrary"),
    )(x.astype(jnp.bfloat16), w.astype(jnp.bfloat16),
      b.reshape(1, N).astype(jnp.float32), residual.astype(jnp.float32),
      gamma.reshape(1, N).astype(jnp.float32),
      beta.reshape(1, N).astype(jnp.float32))


def _flash_attn_kernel(mask_ref, q_ref, k_ref, v_ref, o_ref,
                       m_sc, l_sc, acc_sc, *, scale):
    ki = pl.program_id(2)

    @pl.when(ki == 0)
    def _():
        m_sc[...] = jnp.full_like(m_sc, -jnp.inf)
        l_sc[...] = jnp.zeros_like(l_sc)
        acc_sc[...] = jnp.zeros_like(acc_sc)

    q = q_ref[0]                                     # (tq, D)  bf16
    k = k_ref[0]                                     # (tkv, D) bf16
    s = jax.lax.dot_general(q, k, (((1,), (1,)), ((), ())),
                            preferred_element_type=jnp.float32)   # (tq, tkv)
    s = s * scale + mask_ref[0]                      # (1, tkv) broadcast bias

    m_prev = m_sc[...]
    m_new = jnp.maximum(m_prev, jnp.max(s, axis=-1, keepdims=True))
    alpha = jnp.exp(m_prev - m_new)
    p = jnp.exp(s - m_new)
    l_sc[...] = alpha * l_sc[...] + jnp.sum(p, axis=-1, keepdims=True)
    acc_sc[...] = alpha * acc_sc[...] + jnp.dot(
        p.astype(v_ref.dtype), v_ref[0], preferred_element_type=jnp.float32)
    m_sc[...] = m_new

    @pl.when(ki == pl.num_programs(2) - 1)
    def _():
        o_ref[0] = (acc_sc[...] *
                    pl.reciprocal(l_sc[...], approx=True)).astype(o_ref.dtype)


def flash_attention(q, k, v, ext_mask, *, n_heads, scale, tq=128, tkv=128):
    """q,k,v: (B*n_heads, S, D).  ext_mask: (B, 1, S) additive (0 / -1e4)."""
    BH, S, D = q.shape
    tq = _pick_tile(S, tq, 8)
    tkv = _pick_tile(S, tkv, 128)
    kern = functools.partial(_flash_attn_kernel, scale=scale)
    return pl.pallas_call(
        kern,
        out_shape=jax.ShapeDtypeStruct((BH, S, D), jnp.float32),
        grid=(BH, S // tq, S // tkv),
        in_specs=[
            pl.BlockSpec((1, 1, tkv), lambda bh, qi, ki: (bh // n_heads, 0, ki)),
            pl.BlockSpec((1, tq, D), lambda bh, qi, ki: (bh, qi, 0)),
            pl.BlockSpec((1, tkv, D), lambda bh, qi, ki: (bh, ki, 0)),
            pl.BlockSpec((1, tkv, D), lambda bh, qi, ki: (bh, ki, 0)),
        ],
        out_specs=pl.BlockSpec((1, tq, D), lambda bh, qi, ki: (bh, qi, 0)),
        scratch_shapes=[pltpu.VMEM((tq, 1), jnp.float32),
                        pltpu.VMEM((tq, 1), jnp.float32),
                        pltpu.VMEM((tq, D), jnp.float32)],
        compiler_params=_cparams("parallel", "parallel", "arbitrary"),
    )(ext_mask.astype(jnp.float32),
      q.astype(jnp.bfloat16), k.astype(jnp.bfloat16), v.astype(jnp.bfloat16))


def _layernorm_kernel(x_ref, g_ref, b_ref, o_ref, *, eps):
    h = x_ref[...].astype(jnp.float32)
    mu = jnp.mean(h, axis=-1, keepdims=True)
    var = jnp.mean((h - mu) ** 2, axis=-1, keepdims=True)
    o_ref[...] = ((h - mu) * jax.lax.rsqrt(var + eps) * g_ref[...]
                  + b_ref[...]).astype(o_ref.dtype)


def layernorm(x, gamma, beta, *, eps=1e-12, tm=512):
    M, H = x.shape
    tm = _pick_tile(M, tm, 8)
    kern = functools.partial(_layernorm_kernel, eps=eps)
    return pl.pallas_call(
        kern,
        out_shape=jax.ShapeDtypeStruct((M, H), jnp.float32),
        grid=(M // tm,),
        in_specs=[pl.BlockSpec((tm, H), lambda i: (i, 0)),
                  pl.BlockSpec((1, H), lambda i: (0, 0)),
                  pl.BlockSpec((1, H), lambda i: (0, 0))],
        out_specs=pl.BlockSpec((tm, H), lambda i: (i, 0)),
        compiler_params=_cparams("parallel"),
    )(x, gamma.reshape(1, H), beta.reshape(1, H))


def _seq_avg_kernel(h_ref, o_ref):
    o_ref[...] = jnp.mean(h_ref[...].astype(jnp.float32), axis=1,
                          keepdims=True).astype(o_ref.dtype)


def seq_avg(h):
    """(B, S, H) -> mean over S  == avg_pool1d(kernel=S).squeeze(-1)."""
    B, S, H = h.shape
    out = pl.pallas_call(
        _seq_avg_kernel,
        out_shape=jax.ShapeDtypeStruct((B, 1, H), jnp.float32),
        grid=(B,),
        in_specs=[pl.BlockSpec((1, S, H), lambda b: (b, 0, 0))],
        out_specs=pl.BlockSpec((1, 1, H), lambda b: (b, 0, 0)),
        compiler_params=_cparams("parallel"),
    )(h)
    return out.reshape(B, H)


def _first_last_avg_kernel(f_ref, l_ref, o_ref):
    f = jnp.mean(f_ref[...].astype(jnp.float32), axis=1, keepdims=True)
    l = jnp.mean(l_ref[...].astype(jnp.float32), axis=1, keepdims=True)
    o_ref[...] = ((f + l) * 0.5).astype(o_ref.dtype)


def first_last_avg(first, last):
    B, S, H = first.shape
    out = pl.pallas_call(
        _first_last_avg_kernel,
        out_shape=jax.ShapeDtypeStruct((B, 1, H), jnp.float32),
        grid=(B,),
        in_specs=[pl.BlockSpec((1, S, H), lambda b: (b, 0, 0)),
                  pl.BlockSpec((1, S, H), lambda b: (b, 0, 0))],
        out_specs=pl.BlockSpec((1, 1, H), lambda b: (b, 0, 0)),
        compiler_params=_cparams("parallel"),
    )(first, last)
    return out.reshape(B, H)


# ----------------------------------------------------------------------------
# Tiny BERT encoder built from the kernels above
# ----------------------------------------------------------------------------

def init_params(key, *, vocab, max_pos, type_vocab, H, inter, n_layers):
    def nrm(k, shape):
        return (0.02 * jax.random.normal(k, shape)).astype(jnp.float32)

    keys = iter(jax.random.split(key, 8 + n_layers * 8))
    p = {
        "word_emb": nrm(next(keys), (vocab, H)),
        "pos_emb": nrm(next(keys), (max_pos, H)),
        "type_emb": nrm(next(keys), (type_vocab, H)),
        "emb_ln_g": jnp.ones((H,), jnp.float32),
        "emb_ln_b": jnp.zeros((H,), jnp.float32),
        "pooler_w": nrm(next(keys), (H, H)),
        "pooler_b": jnp.zeros((H,), jnp.float32),
        "layers": [],
    }
    for _ in range(n_layers):
        wq = nrm(next(keys), (H, H))
        wk = nrm(next(keys), (H, H))
        wv = nrm(next(keys), (H, H))
        layer = {
            # fused QKV projection: one MXU pass instead of three
            "w_qkv": jnp.concatenate([wq, wk, wv], axis=1),
            "b_qkv": jnp.zeros((3 * H,), jnp.float32),
            "wo": nrm(next(keys), (H, H)), "bo": jnp.zeros((H,), jnp.float32),
            "ln1_g": jnp.ones((H,), jnp.float32), "ln1_b": jnp.zeros((H,), jnp.float32),
            "w1": nrm(next(keys), (H, inter)), "b1": jnp.zeros((inter,), jnp.float32),
            "w2": nrm(next(keys), (inter, H)), "b2": jnp.zeros((H,), jnp.float32),
            "ln2_g": jnp.ones((H,), jnp.float32), "ln2_b": jnp.zeros((H,), jnp.float32),
        }
        p["layers"].append(layer)
    return p


def bert_layer(x, ext_mask, lp, *, n_heads):
    B, S, H = x.shape
    hd = H // n_heads
    x2 = x.reshape(B * S, H)

    qkv = matmul_bias(x2, lp["w_qkv"], lp["b_qkv"])         # (B*S, 3H)
    q, k, v = jnp.split(qkv, 3, axis=-1)

    def split_heads(t):
        return (t.reshape(B, S, n_heads, hd)
                  .transpose(0, 2, 1, 3)
                  .reshape(B * n_heads, S, hd))

    ctx = flash_attention(split_heads(q), split_heads(k), split_heads(v),
                          ext_mask, n_heads=n_heads, scale=hd ** -0.5)
    ctx = (ctx.reshape(B, n_heads, S, hd)
              .transpose(0, 2, 1, 3)
              .reshape(B * S, H))

    # attention output projection + residual + LayerNorm, fused
    h = matmul_bias_residual_ln(ctx, lp["wo"], lp["bo"], x2,
                                lp["ln1_g"], lp["ln1_b"])
    # FFN: gelu matmul, then second matmul + residual + LayerNorm, fused
    ffn = matmul_bias(h, lp["w1"], lp["b1"], activation="gelu")
    h = matmul_bias_residual_ln(ffn, lp["w2"], lp["b2"], h,
                                lp["ln2_g"], lp["ln2_b"])
    return h.reshape(B, S, H)


def simcse_forward(params, input_ids, attention_mask, token_type_ids,
                   *, n_heads, pooling="first-last-avg"):
    B, S = input_ids.shape
    H = params["word_emb"].shape[1]

    # ---- embeddings (gather is glue; LayerNorm in kernel, no dummy zeros) ----
    positions = jnp.arange(S, dtype=jnp.int32)
    emb = (params["word_emb"][input_ids]
           + params["pos_emb"][positions][None, :, :]
           + params["type_emb"][token_type_ids])
    hidden = layernorm(emb.reshape(B * S, H),
                       params["emb_ln_g"], params["emb_ln_b"]).reshape(B, S, H)

    # ---- (B, 1, S) additive mask; broadcast over heads/queries in-kernel ----
    ext_mask = ((1.0 - attention_mask.astype(jnp.float32)) * -10000.0
                ).reshape(B, 1, S)

    hidden_states = [hidden]          # hidden_states[0] == embeddings output
    for lp in params["layers"]:
        hidden = bert_layer(hidden, ext_mask, lp, n_heads=n_heads)
        hidden_states.append(hidden)
    last_hidden_state = hidden_states[-1]

    if pooling == "cls":
        return last_hidden_state[:, 0]
    if pooling == "pooler":
        cls = last_hidden_state[:, 0]
        return matmul_bias(cls, params["pooler_w"], params["pooler_b"],
                           activation="tanh")
    if pooling == "last-avg":
        return seq_avg(last_hidden_state)
    if pooling == "first-last-avg":
        return first_last_avg(hidden_states[1], last_hidden_state)
    raise ValueError(pooling)


# ----------------------------------------------------------------------------
# Demo
# ----------------------------------------------------------------------------

if __name__ == "__main__":
    B, S = 2, 8
    H, N_HEADS, INTER, N_LAYERS = 32, 2, 64, 2
    VOCAB, MAX_POS, TYPE_VOCAB = 50, 16, 2

    root = jax.random.PRNGKey(0)
    k_params, k_ids = jax.random.split(root)

    params = init_params(k_params, vocab=VOCAB, max_pos=MAX_POS,
                         type_vocab=TYPE_VOCAB, H=H, inter=INTER,
                         n_layers=N_LAYERS)

    input_ids = jax.random.randint(k_ids, (B, S), 0, VOCAB, dtype=jnp.int32)
    attention_mask = jnp.array([[1, 1, 1, 1, 1, 1, 0, 0],
                                [1, 1, 1, 1, 1, 1, 1, 1]], jnp.float32)
    token_type_ids = jnp.zeros((B, S), jnp.int32)

    out = simcse_forward(params, input_ids, attention_mask, token_type_ids,
                         n_heads=N_HEADS, pooling="first-last-avg")
    out = jax.block_until_ready(out)
    assert out.shape == (B, H) and out.dtype == jnp.float32
    print("KERNEL_OK")
</pallas_src>

<mosaic_0001>
module attributes {stable_mosaic.version = 11 : i64} {
  func.func @_layernorm_kernel(%arg0: i32, %arg1: memref<16x32xf32, #tpu.memory_space<vmem>>, %arg2: memref<1x32xf32, #tpu.memory_space<vmem>>, %arg3: memref<1x32xf32, #tpu.memory_space<vmem>>, %arg4: memref<16x32xf32, #tpu.memory_space<vmem>>) attributes {dimension_semantics = [#tpu.dimension_semantics<parallel>], iteration_bounds = array<i64: 1>, scalar_prefetch = 0 : i64, scratch_operands = 0 : i64, tpu.core_type = #tpu.core_type<tc>, window_params = [{transform_indices = @transform_0, window_bounds = array<i64: 16, 32>}, {pipeline_mode = #tpu.pipeline_mode<synchronous>, transform_indices = @transform_1, window_bounds = array<i64: 1, 32>}, {pipeline_mode = #tpu.pipeline_mode<synchronous>, transform_indices = @transform_2, window_bounds = array<i64: 1, 32>}, {transform_indices = @transform_3, window_bounds = array<i64: 16, 32>}]} {
    %c0 = arith.constant 0 : index
    %c0_0 = arith.constant 0 : index
    %0 = vector.load %arg1[%c0, %c0_0] : memref<16x32xf32, #tpu.memory_space<vmem>>, vector<16x32xf32>
    %cst = arith.constant dense<0.000000e+00> : vector<16xf32>
    %1 = vector.multi_reduction <add>, %0, %cst [1] : vector<16x32xf32> to vector<16xf32>
    %2 = vector.shape_cast %1 : vector<16xf32> to vector<16x1xf32>
    %cst_1 = arith.constant 3.200000e+01 : f32
    %3 = vector.broadcast %cst_1 : f32 to vector<16x1xf32>
    %4 = arith.divf %2, %3 : vector<16x1xf32>
    %5 = vector.broadcast %4 : vector<16x1xf32> to vector<16x32xf32>
    %6 = arith.subf %0, %5 : vector<16x32xf32>
    %7 = arith.mulf %6, %6 : vector<16x32xf32>
    %cst_2 = arith.constant dense<0.000000e+00> : vector<16xf32>
    %8 = vector.multi_reduction <add>, %7, %cst_2 [1] : vector<16x32xf32> to vector<16xf32>
    %9 = vector.shape_cast %8 : vector<16xf32> to vector<16x1xf32>
    %cst_3 = arith.constant 3.200000e+01 : f32
    %10 = vector.broadcast %cst_3 : f32 to vector<16x1xf32>
    %11 = arith.divf %9, %10 : vector<16x1xf32>
    %12 = vector.broadcast %4 : vector<16x1xf32> to vector<16x32xf32>
    %13 = arith.subf %0, %12 : vector<16x32xf32>
    %cst_4 = arith.constant 9.99999996E-13 : f32
    %14 = vector.broadcast %cst_4 : f32 to vector<16x1xf32>
    %15 = arith.addf %11, %14 : vector<16x1xf32>
    %16 = math.rsqrt %15 : vector<16x1xf32>
    %17 = vector.broadcast %16 : vector<16x1xf32> to vector<16x32xf32>
    %18 = arith.mulf %13, %17 : vector<16x32xf32>
    %c0_5 = arith.constant 0 : index
    %c0_6 = arith.constant 0 : index
    %19 = vector.load %arg2[%c0_5, %c0_6] : memref<1x32xf32, #tpu.memory_space<vmem>>, vector<1x32xf32>
    %20 = vector.broadcast %19 : vector<1x32xf32> to vector<16x32xf32>
    %21 = arith.mulf %18, %20 : vector<16x32xf32>
    %c0_7 = arith.constant 0 : index
    %c0_8 = arith.constant 0 : index
    %22 = vector.load %arg3[%c0_7, %c0_8] : memref<1x32xf32, #tpu.memory_space<vmem>>, vector<1x32xf32>
    %23 = vector.broadcast %22 : vector<1x32xf32> to vector<16x32xf32>
    %24 = arith.addf %21, %23 : vector<16x32xf32>
    %c0_9 = arith.constant 0 : index
    %c0_10 = arith.constant 0 : index
    %25 = vector.load %arg4[%c0_9, %c0_10] : memref<16x32xf32, #tpu.memory_space<vmem>>, vector<16x32xf32>
    tpu.vector_store %arg4[%c0_9, %c0_10], %24 {strides = array<i32>} : memref<16x32xf32, #tpu.memory_space<vmem>>, vector<16x32xf32>,
    return
  }
  func.func @transform_0(%arg0: i32) -> (i32, i32) {
    %c0_i32 = arith.constant 0 : i32
    %c0_i32_0 = arith.constant 0 : i32
    return %arg0, %c0_i32 : i32, i32
  }
  func.func @transform_1(%arg0: i32) -> (i32, i32) {
    %c0_i32 = arith.constant 0 : i32
    %c0_i32_0 = arith.constant 0 : i32
    %c0_i32_1 = arith.constant 0 : i32
    return %c0_i32, %c0_i32_0 : i32, i32
  }
  func.func @transform_2(%arg0: i32) -> (i32, i32) {
    %c0_i32 = arith.constant 0 : i32
    %c0_i32_0 = arith.constant 0 : i32
    %c0_i32_1 = arith.constant 0 : i32
    return %c0_i32, %c0_i32_0 : i32, i32
  }
  func.func @transform_3(%arg0: i32) -> (i32, i32) {
    %c0_i32 = arith.constant 0 : i32
    %c0_i32_0 = arith.constant 0 : i32
    return %arg0, %c0_i32 : i32, i32
  }
}

</mosaic_0001>

<bundles_post_ra>
// kernel: tpu_custom_call.1
= control target key start
LH: loop header
LB: loop body
LE: loop exit
PB: predicated region body
PF: predicated region fallthrough
CT: control target
= control target key end

     0   :  { %8 = vsyncpa [#allocation3], 0  ;;  %s220_s0 = inlined_call_operand.hbm [shape: f32[16,32], index: 0, kind: input, shape index: {}]   ;;  %s221_s1 = inlined_call_operand.vmem [shape: f32[1,32], index: 1, kind: input, shape index: {}]   ;;  %s222_s2 = inlined_call_operand.vmem [shape: f32[1,32], index: 2, kind: input, shape index: {}]   ;;  %s223_s3 = inlined_call_operand.hbm [shape: f32[16,32], index: 3, kind: output, shape index: {}]  }
   0x1   :  { %9 = vsyncpa [#allocation4], 0  ;;  %s154_s12 = smov [#allocation2]   ;;  %s106_s16 = scalar_lea.hbm %s220_s0, 256 }
   0x2   :  { %s15_s13 = sshll.u32 %s154_s12, 4  ;;  %p107_p0 = scmp.ne.s32.totalorder %s220_s0, %s106_s16  ;;  %s16_s13 = int_to_ptr.vmem [resolvable:$true] %s15_s13 }
   0x3   :  { %p110_p1 = scmp.lt.u32.totalorder %s106_s16, %s220_s0 }
   0x5   :  { %p112_p2 = pnand %p110_p1, %p107_p0 }
   0x7   :  { %115 = shalt.err (!%p112_p2)
}
   0x8   :  { %s116_s21 = scalar_lea.vmem %s16_s13, 256  ;;  %p121_p4 = scmp.lt.s32.totalorder %s16_s13, %s16_s13 }
   0x9   :  { %p117_p3 = scmp.ne.s32.totalorder %s16_s13, %s116_s21  ;;  %p122_p5 = scmp.lt.s32.totalorder %s116_s21, %s116_s21 }
   0xb   :  { %p123_p6 = por %p122_p5, %p121_p4 }
   0xd   :  { %p124_p7 = pnand %p123_p6, %p117_p3 }
   0xf   :  { %127 = shalt.err (!%p124_p7)
}
  0x10   :  { %s155_s22 = smov 128   ;;  %s156_s23 = smov 8  }
  0x11   :  { %21 = dma.hbm_to_vmem [thread:$0]  %s220_s0, 256, %s16_s13, [#allocation3], %s155_s22, %s155_s22, %s156_s23  }
  0x12   :  { %150 = dma.done.wait [#allocation3], 256  }
  0x13   :  { %151 = vsyncadd [#allocation3], 4294967040  ;;  %vm31_vm0 = vcmask 261120   ;;  %v29_v0 = vld [vmem:[#allocation2] sm:$0xff]  ;;  %v30_v1 = vld [vmem:[#allocation2 + $0x8] sm:$0xff]  ;;  %s157_s29 = smov [#allocation5]  }
  0x14   :  { %v32_v2 = vsel %vm31_vm0, %v29_v0, 0.0  ;;  %v35_v3 = vsel %vm31_vm0, %v30_v1, 0.0  ;;  %v96_v21 = vld [vmem:[%s221_s1] ss:$0 sm:$0xff]  ;;  %s84_s30 = sshll.u32 %s157_s29, 4  ;;  %s85_s30 = int_to_ptr.vmem [resolvable:$true] %s84_s30 }
  0x15   :  { %33 = vadd.xlane.f32.xlu0 %v32_v2  ;;  %v97_v23 = vld [vmem:[%s222_s2] ss:$0 sm:$0xff]  ;;  %s128_s4 = scalar_lea.vmem %s85_s30, 256  ;;  %p133_p9 = scmp.lt.s32.totalorder %s85_s30, %s85_s30 }
  0x16   :  { %p129_p8 = scmp.ne.s32.totalorder %s85_s30, %s128_s4  ;;  %p134_p10 = scmp.lt.s32.totalorder %s128_s4, %s128_s4 }
  0x18   :  { %p135_p11 = por %p134_p10, %p133_p9 }
  0x19   :  { %36 = vadd.xlane.f32.xlu0 %v35_v3 }
  0x1a   :  { %p136_p12 = pnand %p135_p11, %p129_p8 }
  0xa2   :  { %v34_v4 = vpop.xlane.xlu0 %33 }
  0xa3   :  { %v39_v5 = vmul.f32 0.03125, %v34_v4 }
  0xa5   :  { %v41_v6 = vsub.f32 %v29_v0, %v39_v5 }
  0xa6   :  { %v37_v7 = vpop.xlane.xlu0 %36 }
  0xa7   :  { %v40_v8 = vmul.f32 0.03125, %v37_v7  ;;  %v43_v9 = vmul.f32 %v41_v6, %v41_v6 }
  0xa9   :  { %v42_v10 = vsub.f32 %v30_v1, %v40_v8  ;;  %v45_v11 = vsel %vm31_vm0, %v43_v9, 0.0 }
  0xaa   :  { %46 = vadd.xlane.f32.xlu1 %v45_v11 }
  0xab   :  { %v44_v12 = vmul.f32 %v42_v10, %v42_v10 }
  0xad   :  { %v48_v13 = vsel %vm31_vm0, %v44_v12, 0.0 }
  0xae   :  { %49 = vadd.xlane.f32.xlu1 %v48_v13 }
 0x137   :  { %v47_v14 = vpop.xlane.xlu1 %46 }
 0x138   :  { %v51_v15 = vmul.f32 0.03125, %v47_v14 }
 0x13a   :  { %v53_v16 = vadd.f32 1e-12, %v51_v15 }
 0x13b   :  { %v50_v17 = vpop.xlane.xlu1 %49 }
 0x13c   :  { %102 = vrsqrt.f32 %v53_v16  ;;  %v52_v18 = vmul.f32 0.03125, %v50_v17 }
 0x13e   :  { %v54_v19 = vadd.f32 1e-12, %v52_v18 }
 0x140   :  { %104 = vrsqrt.f32 %v54_v19 }
 0x146   :  { %v103_v20 = vpop.eup %102 }
 0x147   :  { %v57_v22 = vmul.f32 %v103_v20, %v41_v6 }
 0x149   :  { %v66_v24 = vmul.f32 %v96_v21, %v57_v22 }
 0x14a   :  { %v105_v25 = vpop.eup %104 }
 0x14b   :  { %v58_v26 = vmul.f32 %v105_v25, %v42_v10  ;;  %v75_v27 = vadd.f32 %v97_v23, %v66_v24 }
 0x14d   :  { %v67_v28 = vmul.f32 %v96_v21, %v58_v26  ;;  %77 = vst.msk [vmem:[#allocation5] sm:$0xff] %vm31_vm0, %v75_v27 }
 0x14f   :  { %v76_v29 = vadd.f32 %v97_v23, %v67_v28 }
 0x151   :  { %78 = vst.msk [vmem:[#allocation5 + $0x8] sm:$0xff] %vm31_vm0, %v76_v29 }
 0x152   :  { %139 = shalt.err (!%p136_p12)
}
 0x153   :  { %s140_s5 = scalar_lea.hbm %s223_s3, 256 }
 0x154   :  { %p141_p13 = scmp.ne.s32.totalorder %s223_s3, %s140_s5  ;;  %p144_p0 = scmp.lt.u32.totalorder %s140_s5, %s223_s3 }
 0x156   :  { %p146_p1 = pnand %p144_p0, %p141_p13 }
 0x158   :  { %149 = shalt.err (!%p146_p1)
}
 0x159   :  { %90 = dma.vmem_to_hbm [thread:$0]  %s85_s30, 256, %s223_s3, [#allocation4], %s155_s22, %s155_s22, %s156_s23  }
 0x15a   :  { %152 = dma.done.wait [#allocation4], 256  }
 0x15b   :  { %153 = vsyncadd [#allocation4], 4294967040 }
 0x15c   :  { %94 = vsyncpa [#allocation3], 1 }
 0x15d   :  { %95 = vsyncpa [#allocation4], 1 }

</bundles_post_ra>
